<compile_context>
chip_gen: v5e
topology: v5e:2x2
jax: 0.10.0
libtpu: 0.0.40
codegen_flags: <defaults>
</compile_context>

<pallas_src>
import jax
import jax.numpy as jnp
from jax.experimental import pallas as pl
from jax.experimental.pallas import tpu as pltpu


def _normalize_kernel(x_ref, scale_ref, bias_ref, o_ref):
    # x_ref:     (BR, BC) raw pixel block (uint8 / int / float) in VMEM.
    # scale_ref: (BR, 1)  f32 per-row scale  = 1 / (255 * std[c])
    # bias_ref:  (BR, 1)  f32 per-row bias   = -mean[c] / std[c]
    # Cast in-kernel; fused mul+add only (VPU), EUP/XLU left idle.
    x = x_ref[...].astype(jnp.float32)
    o_ref[...] = x * scale_ref[...] + bias_ref[...]


def _pick_block(nc, hw):
    """Block shape for the flattened (nc, hw) slab.

    Targets ~4 MiB of f32 output per grid step so per-step pipeline overhead is
    amortized without blowing past v7x's smaller VMEM. Sublane dim is a
    multiple of 32 (uint8-safe tiling) or full extent; lane dim is a multiple
    of 128 or full extent (unmasked stores whenever possible).
    """
    max_out_elems = (4 << 20) // 4  # 4 MiB of f32 output per block

    if hw > max_out_elems and hw % 128 == 0:
        # Very wide rows: tile the lane dim, a handful of rows per block.
        br = nc if nc < 32 else 32
        bc = max(128, (max_out_elems // br // 128) * 128)
        return br, bc

    # Common case: keep full rows (lane dim = full extent, contiguous DMA).
    bc = hw
    rows = max(1, max_out_elems // bc)
    if rows >= nc:
        br = nc
    elif rows >= 32:
        br = (rows // 32) * 32
    else:
        br = nc if nc <= 32 else 32
    return br, bc


def custom_to_tensor_normalize(x, mean, std):
    """Pallas TPU equivalent of CustomToTensorNormalize.forward.

    x: (N, C, H, W), pixel values in [0, 255] (typically uint8 — passed to the
       kernel without a wrapper-side cast).
    mean, std: length-C per-channel stats.
    Returns float32 (N, C, H, W): ((x / 255) - mean) / std.
    """
    N, C, H, W = x.shape
    mean = jnp.asarray(mean, dtype=jnp.float32).reshape(C)
    std = jnp.asarray(std, dtype=jnp.float32).reshape(C)

    # Fold /255 and normalize into a single scale/bias.
    scale_c = 1.0 / (255.0 * std)      # (C,)
    bias_c = -mean / std               # (C,)

    # Lane-dense layout: NCHW is contiguous over H*W, so this reshape is free.
    nc, hw = N * C, H * W
    x_flat = x.reshape(nc, hw)
    # Per-row (= per (n, c)) constants; row r of the slab has channel r % C.
    scale_rows = jnp.tile(scale_c, N).reshape(nc, 1)
    bias_rows = jnp.tile(bias_c, N).reshape(nc, 1)

    br, bc = _pick_block(nc, hw)
    grid = (pl.cdiv(nc, br), pl.cdiv(hw, bc))

    itemsize = jnp.dtype(x.dtype).itemsize
    cost = pl.CostEstimate(
        flops=2 * x_flat.size,
        transcendentals=0,
        bytes_accessed=x_flat.size * itemsize + x_flat.size * 4 + 2 * nc * 4,
    )

    # Double-buffered in+out blocks; keep the VMEM request modest so the same
    # config is valid on v5e / v6e (128 MiB phys) and v7x (64 MiB phys).
    block_bytes = br * bc * (itemsize + 4)
    vmem_limit = int(min(48 << 20, max(16 << 20, 3 * block_bytes)))

    out_flat = pl.pallas_call(
        _normalize_kernel,
        out_shape=jax.ShapeDtypeStruct((nc, hw), jnp.float32),
        grid=grid,
        in_specs=[
            pl.BlockSpec((br, bc), lambda i, j: (i, j)),  # raw pixel block
            pl.BlockSpec((br, 1), lambda i, j: (i, 0)),   # per-row scale
            pl.BlockSpec((br, 1), lambda i, j: (i, 0)),   # per-row bias
        ],
        out_specs=pl.BlockSpec((br, bc), lambda i, j: (i, j)),
        compiler_params=pltpu.CompilerParams(
            dimension_semantics=("parallel", "parallel"),
            vmem_limit_bytes=vmem_limit,
        ),
        cost_estimate=cost,
    )(x_flat, scale_rows, bias_rows)

    return out_flat.reshape(N, C, H, W)


if __name__ == "__main__":
    key = jax.random.PRNGKey(0)
    N, C, H, W = 2, 4, 16, 16

    # Deterministic "image" input: integer pixel values in [0, 255], uint8.
    x_u8 = jax.random.randint(key, (N, C, H, W), 0, 256, dtype=jnp.int32).astype(
        jnp.uint8
    )

    # Per-channel normalization params (module __init__ args).
    mean_lst = jnp.array([0.485, 0.456, 0.406, 0.450], dtype=jnp.float32)
    std_lst = jnp.array([0.229, 0.224, 0.225, 0.226], dtype=jnp.float32)

    out = custom_to_tensor_normalize(x_u8, mean_lst, std_lst)
    out = jax.block_until_ready(out)

    # Pure-JAX reference check.
    xf = x_u8.astype(jnp.float32) / 255.0
    ref = (xf - mean_lst[None, :, None, None]) / std_lst[None, :, None, None]
    assert out.shape == (N, C, H, W) and out.dtype == jnp.float32
    assert jnp.allclose(out, ref, atol=1e-5, rtol=1e-5)

    print("KERNEL_OK")
</pallas_src>

<mosaic_0001>
module attributes {stable_mosaic.version = 11 : i64} {
  func.func @_normalize_kernel(%arg0: i32, %arg1: i32, %arg2: memref<8x256xi8, #tpu.memory_space<vmem>>, %arg3: memref<8x1xf32, #tpu.memory_space<vmem>>, %arg4: memref<8x1xf32, #tpu.memory_space<vmem>>, %arg5: memref<8x256xf32, #tpu.memory_space<vmem>>) attributes {dimension_semantics = [#tpu.dimension_semantics<parallel>, #tpu.dimension_semantics<parallel>], iteration_bounds = array<i64: 1, 1>, scalar_prefetch = 0 : i64, scratch_operands = 0 : i64, tpu.core_type = #tpu.core_type<tc>, window_params = [{transform_indices = @transform_0, window_bounds = array<i64: 8, 256>}, {transform_indices = @transform_1, window_bounds = array<i64: 8, 1>}, {transform_indices = @transform_2, window_bounds = array<i64: 8, 1>}, {transform_indices = @transform_3, window_bounds = array<i64: 8, 256>}]} {
    %c0 = arith.constant 0 : index
    %c0_0 = arith.constant 0 : index
    %0 = vector.load %arg2[%c0, %c0_0] : memref<8x256xi8, #tpu.memory_space<vmem>>, vector<8x256xi8>
    %1 = arith.uitofp %0 : vector<8x256xi8> to vector<8x256xf32>
    %c0_1 = arith.constant 0 : index
    %c0_2 = arith.constant 0 : index
    %2 = vector.load %arg3[%c0_1, %c0_2] : memref<8x1xf32, #tpu.memory_space<vmem>>, vector<8x1xf32>
    %3 = vector.broadcast %2 : vector<8x1xf32> to vector<8x256xf32>
    %4 = arith.mulf %1, %3 : vector<8x256xf32>
    %c0_3 = arith.constant 0 : index
    %c0_4 = arith.constant 0 : index
    %5 = vector.load %arg4[%c0_3, %c0_4] : memref<8x1xf32, #tpu.memory_space<vmem>>, vector<8x1xf32>
    %6 = vector.broadcast %5 : vector<8x1xf32> to vector<8x256xf32>
    %7 = arith.addf %4, %6 : vector<8x256xf32>
    %c0_5 = arith.constant 0 : index
    %c0_6 = arith.constant 0 : index
    %8 = vector.load %arg5[%c0_5, %c0_6] : memref<8x256xf32, #tpu.memory_space<vmem>>, vector<8x256xf32>
    tpu.vector_store %arg5[%c0_5, %c0_6], %7 {strides = array<i32>} : memref<8x256xf32, #tpu.memory_space<vmem>>, vector<8x256xf32>,
    return
  }
  func.func @transform_0(%arg0: i32, %arg1: i32) -> (i32, i32) {
    %c0_i32 = arith.constant 0 : i32
    return %arg0, %arg1 : i32, i32
  }
  func.func @transform_1(%arg0: i32, %arg1: i32) -> (i32, i32) {
    %c0_i32 = arith.constant 0 : i32
    %c0_i32_0 = arith.constant 0 : i32
    return %arg0, %c0_i32 : i32, i32
  }
  func.func @transform_2(%arg0: i32, %arg1: i32) -> (i32, i32) {
    %c0_i32 = arith.constant 0 : i32
    %c0_i32_0 = arith.constant 0 : i32
    return %arg0, %c0_i32 : i32, i32
  }
  func.func @transform_3(%arg0: i32, %arg1: i32) -> (i32, i32) {
    %c0_i32 = arith.constant 0 : i32
    return %arg0, %arg1 : i32, i32
  }
}

</mosaic_0001>

<bundles_post_ra>
// kernel: tpu_custom_call.1
= control target key start
LH: loop header
LB: loop body
LE: loop exit
PB: predicated region body
PF: predicated region fallthrough
CT: control target
= control target key end

     0   :  { %s119_s0 = inlined_call_operand.vmem [shape: u8[8,256], index: 0, kind: input, shape index: {}]   ;;  %s120_s1 = inlined_call_operand.vmem [shape: f32[8,1], index: 1, kind: input, shape index: {}]   ;;  %s121_s2 = inlined_call_operand.vmem [shape: f32[8,1], index: 2, kind: input, shape index: {}]   ;;  %s122_s3 = inlined_call_operand.hbm [shape: f32[8,256], index: 3, kind: output, shape index: {}]  }
   0x1   :  { %v22_v0 = vld [vmem:[%s120_s1] sm:$0xff] }
   0x2   :  { %8 = vsyncpa [#allocation3], 0  ;;  %v85_v1 = vmov 0   ;;  %v30_v2 = vld [vmem:[%s121_s2] sm:$0xff]  ;;  %s86_s1 = smov [#allocation2]   ;;  %s47_s2 = sshll.u32 %s122_s3, 4  ;;  %s48_s2 = int_to_ptr.hbm [resolvable:$true] %s47_s2 }
   0x3   :  { %58 = vset.pattern.permute.xlu0 %v85_v1  ;;  %v15_v3 = vld [vmem:[%s119_s0] sm:$0xf]  ;;  %s45_s18 = sshll.u32 %s86_s1, 4  ;;  %s46_s18 = int_to_ptr.vmem [resolvable:$true] %s45_s18 }
   0x4   :  { %25 = vperm.xlu0 %58, %v22_v0   ;;  %v16_v4 = vunpack.c.0.s8 %v15_v3  ;;  %v17_v5 = vunpack.c.1.s8 %v15_v3 }
   0x6   :  { %v18_v6 = vand.u32 255, %v16_v4  ;;  %v19_v7 = vand.u32 255, %v17_v5 }
   0x8   :  { %v20_v9 = vcvt.s32.f32 %v18_v6  ;;  %v21_v10 = vcvt.s32.f32 %v19_v7 }
   0xc   :  { %33 = vperm.xlu0 %58, %v30_v2  }
  0x76   :  { %v26_v8 = vpop.permute.xlu0 %25 }
  0x77   :  { %v28_v11 = vmul.f32 %v26_v8, %v20_v9  ;;  %v29_v12 = vmul.f32 %v26_v8, %v21_v10 }
  0x7e   :  { %v34_v13 = vpop.permute.xlu0 %33 }
  0x7f   :  { %v36_v14 = vadd.f32 %v34_v13, %v28_v11  ;;  %v37_v15 = vadd.f32 %v34_v13, %v29_v12 }
  0x81   :  { %38 = vst [vmem:[#allocation2] sm:$0xff] %v36_v14 }
  0x82   :  { %39 = vst [vmem:[#allocation2 + $0x8] sm:$0xff] %v37_v15 }
  0x83   :  { %50 = dma.vmem_to_hbm [thread:$0]  %s46_s18, 256, %s48_s2, [#allocation3]  }
  0x84   :  { %83 = dma.done.wait [#allocation3], 256  }
  0x85   :  { %84 = vsyncadd [#allocation3], 4294967040 }
  0x86   :  { %55 = vsyncpa [#allocation3], 1 }

</bundles_post_ra>
